<compile_context>
chip_gen: v7x
topology: tpu7x:2x2x1
jax: 0.10.0
libtpu: 0.0.40
codegen_flags: <defaults>
</compile_context>

<pallas_src>
import jax
import jax.numpy as jnp
from jax.experimental import pallas as pl
from jax.experimental.pallas import tpu as pltpu

N_NEIGHBORS = 6


def _round_up(x, m):
    return (x + m - 1) // m * m


def _build_norm_adj_padded(edge_index, num_nodes, n_pad, dtype):
    """PyG GCN symmetric normalization with add_self_loops=False, scattered
    directly into the padded (n_pad, n_pad) buffer.

    out[col] += deg^-1/2[row] * deg^-1/2[col] * x[row]  =>  A[col, row] = norm.
    """
    row = edge_index[0]
    col = edge_index[1]
    ones = jnp.ones(row.shape[0], jnp.float32)
    deg = jnp.zeros((num_nodes,), jnp.float32).at[col].add(ones)
    deg_inv_sqrt = jnp.where(deg > 0, 1.0 / jnp.sqrt(deg), 0.0)
    norm = deg_inv_sqrt[row] * deg_inv_sqrt[col]
    adj = jnp.zeros((n_pad, n_pad), jnp.float32).at[col, row].add(norm)
    return adj.astype(dtype)


def _proj_kernel(x_ref, w1t_ref, w2t_ref, b2_ref, xw1_ref, intra_ref):
    """Two MXU dots straight into the outputs: xw1 = x @ W1^T ; intra = x @ W2^T + b2."""
    x = x_ref[...]
    xw1_ref[...] = jnp.dot(
        x, w1t_ref[...], preferred_element_type=jnp.float32).astype(xw1_ref.dtype)
    intra_ref[...] = (
        jnp.dot(x, w2t_ref[...], preferred_element_type=jnp.float32)
        + b2_ref[...]).astype(intra_ref.dtype)


def _agg_kernel(adj_ref, xw1_ref, b1_ref, msg_ref):
    """msg_tile = b1 + sum_k adj[i, k] @ xw1[k].

    The output BlockSpec is constant along the contraction axis, so msg_ref is
    VMEM-resident across k and serves directly as the f32 accumulator.
    """
    k = pl.program_id(1)

    @pl.when(k == 0)
    def _():
        msg_ref[...] = jnp.zeros_like(msg_ref) + b1_ref[...]

    msg_ref[...] += jnp.dot(adj_ref[...], xw1_ref[...],
                            preferred_element_type=jnp.float32)


def _spec(shape, index_map, single_buffer=False):
    if single_buffer:
        return pl.BlockSpec(shape, index_map, pipeline_mode=pl.Buffered(1))
    return pl.BlockSpec(shape, index_map)


def celcomen_forward(gex, edge_index, batch, w1, b1, w2, b2,
                     n_neighbors=N_NEIGHBORS):
    """Returns (msg, msg_intra, log_z_mft) matching celcomen.forward semantics.

    `batch` is accepted for API parity but (as in the PyTorch module) unused.
    """
    del batch
    n, d = gex.shape
    f32, bf16 = jnp.float32, jnp.bfloat16

    # ---- Gene-axis padding & K1 column tiling (caps resident weight VMEM) ----
    d_pad = _round_up(d, 128)
    if d_pad > 1024:
        d_pad = _round_up(d, 512)
        tc = 512                      # column-tile the gene axis for big panels
    else:
        tc = d_pad                    # single column tile: weights stay resident
    n_ctiles = d_pad // tc

    # ---- Spot-axis padding & tile sizes ----
    if n <= 512:
        tm2 = tk = _round_up(n, 8)    # single adjacency tile
        n_pad = tm2
    else:
        tk = 256                      # contraction tile over adjacency columns
        tm2 = 512                     # K2 row tile: halves re-streamed xw1 bytes
        n_pad = _round_up(n, tm2)     # keeps >= 2 row tiles for megacore on v7x
    tm1 = n_pad if n_pad <= 512 else 256   # K1 row tile (divides n_pad)

    # ---- Padded bf16 MXU operands (f32 accumulation inside the kernels) ----
    gex32 = gex.astype(f32)
    gex_p = jnp.zeros((n_pad, d_pad), bf16).at[:n, :d].set(gex32.astype(bf16))
    w1t_p = jnp.zeros((d_pad, d_pad), bf16).at[:d, :d].set(
        w1.astype(f32).T.astype(bf16))
    w2t_p = jnp.zeros((d_pad, d_pad), bf16).at[:d, :d].set(
        w2.astype(f32).T.astype(bf16))
    b1_p = jnp.zeros((1, d_pad), f32).at[:, :d].set(
        jnp.reshape(b1, (1, d)).astype(f32))
    b2_p = jnp.zeros((1, d_pad), f32).at[:, :d].set(
        jnp.reshape(b2, (1, d)).astype(f32))
    adj_p = _build_norm_adj_padded(edge_index, n, n_pad, bf16)

    # ---- Kernel 1: projections, tiled over spot rows x gene-column tiles ----
    const_w = n_ctiles == 1           # weight/bias blocks are grid-constant
    w_bufs = 1 if const_w else 2
    k1_vmem = (2 * tm1 * d_pad * 2                 # gex tile (bf16, dbl-buffered)
               + w_bufs * 2 * d_pad * tc * 2       # W1^T, W2^T (bf16)
               + w_bufs * tc * 4                   # b2
               + 2 * tm1 * tc * 2                  # xw1 out (bf16, dbl-buffered)
               + 2 * tm1 * tc * 4)                 # intra out (f32, dbl-buffered)
    xw1_p, msg_intra_p = pl.pallas_call(
        _proj_kernel,
        out_shape=(jax.ShapeDtypeStruct((n_pad, d_pad), bf16),
                   jax.ShapeDtypeStruct((n_pad, d_pad), f32)),
        grid_spec=pltpu.PrefetchScalarGridSpec(
            num_scalar_prefetch=0,
            grid=(n_pad // tm1, n_ctiles),
            in_specs=[_spec((tm1, d_pad), lambda i, j: (i, 0)),
                      _spec((d_pad, tc), lambda i, j: (0, j), const_w),
                      _spec((d_pad, tc), lambda i, j: (0, j), const_w),
                      _spec((1, tc), lambda i, j: (0, j), const_w)],
            out_specs=(pl.BlockSpec((tm1, tc), lambda i, j: (i, j)),
                       pl.BlockSpec((tm1, tc), lambda i, j: (i, j))),
        ),
        compiler_params=pltpu.CompilerParams(
            dimension_semantics=("parallel", "parallel"),
            vmem_limit_bytes=max(32 << 20,
                                 min(k1_vmem * 5 // 4 + (2 << 20), 120 << 20))),
        cost_estimate=pl.CostEstimate(
            flops=4 * n_pad * d_pad * d_pad,
            transcendentals=0,
            bytes_accessed=(n_ctiles * n_pad * d_pad * 2   # gex per column tile
                            + 2 * d_pad * d_pad * 2        # weights
                            + n_pad * d_pad * (2 + 4)      # xw1 (bf16) + intra (f32)
                            + d_pad * 4)),
    )(gex_p, w1t_p, w2t_p, b2_p)

    # ---- Kernel 2: msg = A_norm @ xw1 + b1 (rows parallel, contraction arbitrary) ----
    k2_vmem = (2 * tm2 * tk * 2          # adjacency tile (bf16, dbl-buffered)
               + 2 * tk * d_pad * 2      # xw1 tile (bf16, dbl-buffered)
               + d_pad * 4               # b1 (single-buffered)
               + 2 * tm2 * d_pad * 4)    # msg out (f32, dbl-buffered)
    msg_p = pl.pallas_call(
        _agg_kernel,
        out_shape=jax.ShapeDtypeStruct((n_pad, d_pad), f32),
        grid_spec=pltpu.PrefetchScalarGridSpec(
            num_scalar_prefetch=0,
            grid=(n_pad // tm2, n_pad // tk),
            in_specs=[pl.BlockSpec((tm2, tk), lambda i, k: (i, k)),
                      pl.BlockSpec((tk, d_pad), lambda i, k: (k, 0)),
                      _spec((1, d_pad), lambda i, k: (0, 0), True)],
            out_specs=pl.BlockSpec((tm2, d_pad), lambda i, k: (i, 0)),
        ),
        compiler_params=pltpu.CompilerParams(
            dimension_semantics=("parallel", "arbitrary"),
            vmem_limit_bytes=max(32 << 20,
                                 min(k2_vmem * 5 // 4 + (2 << 20), 120 << 20))),
        cost_estimate=pl.CostEstimate(
            flops=2 * n_pad * n_pad * d_pad,
            transcendentals=0,
            bytes_accessed=(n_pad * n_pad * 2                     # adjacency (bf16)
                            + (n_pad // tm2) * n_pad * d_pad * 2  # xw1 re-reads
                            + n_pad * d_pad * 4                   # msg write
                            + d_pad * 4)),
    )(adj_p, xw1_p, b1_p)

    msg = msg_p[:n, :d]
    msg_intra = msg_intra_p[:n, :d]

    # ---- log_Z_mft: needs the *global* gene mean -> plain f32 JAX (O(D^2)). ----
    mean_row = jnp.mean(gex32, axis=0, keepdims=True)                     # (1, D)
    w1f, w2f = w1.astype(f32), w2.astype(f32)
    gv = mean_row @ (n_neighbors * w1f + 2.0 * w2f).T
    g = jnp.sqrt(jnp.sum(gv * gv))
    tmp = mean_row @ (w2f + 0.5 * n_neighbors * w1f)
    z_mean = -jnp.float32(n) * jnp.sum(tmp * mean_row)

    g_c = jnp.maximum(g, jnp.float32(1e-20))
    z_big = n * (g_c - jnp.log(g_c))
    # log((e^g - e^-g)/g) == -g + log(expm1(2g)) - log(g)   (stable for small g)
    z_small = n * (-g_c + jnp.log(jnp.expm1(2.0 * g_c)) - jnp.log(g_c))
    z_interaction = jnp.where(g > 20.0, z_big, z_small)

    log_z_mft = jnp.reshape(z_mean + z_interaction, (1, 1)).astype(f32)
    return msg, msg_intra, log_z_mft


if __name__ == "__main__":
    key = jax.random.PRNGKey(0)
    k_gex, k_w1, k_w2, k_b2 = jax.random.split(key, 4)

    num_spots, num_genes = 16, 8          # input_dim == output_dim (square g2g)

    # Deterministic synthetic parameters (module __init__ shapes; no checkpoint load).
    gex = jax.random.uniform(k_gex, (num_spots, num_genes), jnp.float32)
    w1 = 0.1 * jax.random.normal(k_w1, (num_genes, num_genes), jnp.float32)   # conv1.lin.weight
    b1 = jnp.zeros((1, num_genes), jnp.float32)                               # GCNConv bias (zeros)
    w2 = 0.1 * jax.random.normal(k_w2, (num_genes, num_genes), jnp.float32)   # lin.weight
    b2 = 0.01 * jax.random.normal(k_b2, (1, num_genes), jnp.float32)          # lin.bias

    # Simple bidirectional ring graph over the spots.
    idx = jnp.arange(num_spots, dtype=jnp.int32)
    row = jnp.concatenate([idx, idx])
    col = jnp.concatenate([(idx + 1) % num_spots, (idx - 1) % num_spots])
    edge_index = jnp.stack([row, col], axis=0)          # (2, E)
    batch = jnp.zeros((num_spots,), jnp.int32)          # single graph

    msg, msg_intra, log_z_mft = celcomen_forward(
        gex, edge_index, batch, w1, b1, w2, b2, n_neighbors=N_NEIGHBORS)
    jax.block_until_ready((msg, msg_intra, log_z_mft))

    # Pure-JAX f32 reference (kernels use bf16 MXU inputs -> ~1e-2 tolerance).
    a_norm = _build_norm_adj_padded(edge_index, num_spots, num_spots, jnp.float32)
    msg_expect = a_norm @ (gex @ w1.T) + b1
    intra_expect = gex @ w2.T + b2
    mean_row = jnp.mean(gex, axis=0, keepdims=True)
    g_ref = jnp.linalg.norm(mean_row @ (N_NEIGHBORS * w1 + 2.0 * w2).T)
    z_mean_ref = -num_spots * jnp.sum((mean_row @ (w2 + 0.5 * N_NEIGHBORS * w1)) * mean_row)
    z_int_ref = jnp.where(
        g_ref > 20.0,
        num_spots * (g_ref - jnp.log(g_ref)),
        num_spots * jnp.log((jnp.exp(g_ref) - jnp.exp(-g_ref)) / g_ref))
    logz_expect = z_mean_ref + z_int_ref

    assert jnp.allclose(msg, msg_expect, atol=2e-2, rtol=2e-2)
    assert jnp.allclose(msg_intra, intra_expect, atol=2e-2, rtol=2e-2)
    assert jnp.allclose(log_z_mft[0, 0], logz_expect, atol=1e-3, rtol=1e-3)

    print("KERNEL_OK")
</pallas_src>

<mosaic_0001>
module attributes {stable_mosaic.version = 11 : i64} {
  func.func @_proj_kernel(%arg0: i32, %arg1: i32, %arg2: memref<16x128xbf16, #tpu.memory_space<vmem>>, %arg3: memref<128x128xbf16, #tpu.memory_space<vmem>>, %arg4: memref<128x128xbf16, #tpu.memory_space<vmem>>, %arg5: memref<1x128xf32, #tpu.memory_space<vmem>>, %arg6: memref<16x128xbf16, #tpu.memory_space<vmem>>, %arg7: memref<16x128xf32, #tpu.memory_space<vmem>>) attributes {dimension_semantics = [#tpu.dimension_semantics<parallel>, #tpu.dimension_semantics<parallel>], iteration_bounds = array<i64: 1, 1>, scalar_prefetch = 0 : i64, scratch_operands = 0 : i64, tpu.core_type = #tpu.core_type<tc>, window_params = [{transform_indices = @transform_0, window_bounds = array<i64: 16, 128>}, {pipeline_mode = #tpu.pipeline_mode<synchronous>, transform_indices = @transform_1, window_bounds = array<i64: 128, 128>}, {pipeline_mode = #tpu.pipeline_mode<synchronous>, transform_indices = @transform_2, window_bounds = array<i64: 128, 128>}, {pipeline_mode = #tpu.pipeline_mode<synchronous>, transform_indices = @transform_3, window_bounds = array<i64: 1, 128>}, {transform_indices = @transform_4, window_bounds = array<i64: 16, 128>}, {transform_indices = @transform_5, window_bounds = array<i64: 16, 128>}]} {
    %c0 = arith.constant 0 : index
    %c0_0 = arith.constant 0 : index
    %0 = vector.load %arg2[%c0, %c0_0] : memref<16x128xbf16, #tpu.memory_space<vmem>>, vector<16x128xbf16>
    %c0_1 = arith.constant 0 : index
    %c0_2 = arith.constant 0 : index
    %1 = vector.load %arg3[%c0_1, %c0_2] : memref<128x128xbf16, #tpu.memory_space<vmem>>, vector<128x128xbf16>
    %cst = arith.constant dense<0.000000e+00> : vector<16x128xf32>
    %2 = tpu.matmul %0, %1, %cst {dimension_numbers = #tpu.dot_dimension_numbers<[1], [0], [0], [1], [0, 0, 1, 1], [], []>} : vector<16x128xbf16>, vector<128x128xbf16>, vector<16x128xf32> -> vector<16x128xf32>
    %3 = arith.truncf %2 : vector<16x128xf32> to vector<16x128xbf16>
    %c0_3 = arith.constant 0 : index
    %c0_4 = arith.constant 0 : index
    %4 = vector.load %arg6[%c0_3, %c0_4] : memref<16x128xbf16, #tpu.memory_space<vmem>>, vector<16x128xbf16>
    tpu.vector_store %arg6[%c0_3, %c0_4], %3 {strides = array<i32>} : memref<16x128xbf16, #tpu.memory_space<vmem>>, vector<16x128xbf16>,
    %c0_5 = arith.constant 0 : index
    %c0_6 = arith.constant 0 : index
    %5 = vector.load %arg4[%c0_5, %c0_6] : memref<128x128xbf16, #tpu.memory_space<vmem>>, vector<128x128xbf16>
    %cst_7 = arith.constant dense<0.000000e+00> : vector<16x128xf32>
    %6 = tpu.matmul %0, %5, %cst_7 {dimension_numbers = #tpu.dot_dimension_numbers<[1], [0], [0], [1], [0, 0, 1, 1], [], []>} : vector<16x128xbf16>, vector<128x128xbf16>, vector<16x128xf32> -> vector<16x128xf32>
    %c0_8 = arith.constant 0 : index
    %c0_9 = arith.constant 0 : index
    %7 = vector.load %arg5[%c0_8, %c0_9] : memref<1x128xf32, #tpu.memory_space<vmem>>, vector<1x128xf32>
    %8 = vector.broadcast %7 : vector<1x128xf32> to vector<16x128xf32>
    %9 = arith.addf %6, %8 : vector<16x128xf32>
    %c0_10 = arith.constant 0 : index
    %c0_11 = arith.constant 0 : index
    %10 = vector.load %arg7[%c0_10, %c0_11] : memref<16x128xf32, #tpu.memory_space<vmem>>, vector<16x128xf32>
    tpu.vector_store %arg7[%c0_10, %c0_11], %9 {strides = array<i32>} : memref<16x128xf32, #tpu.memory_space<vmem>>, vector<16x128xf32>,
    return
  }
  func.func @transform_0(%arg0: i32, %arg1: i32) -> (i32, i32) {
    %c0_i32 = arith.constant 0 : i32
    %c0_i32_0 = arith.constant 0 : i32
    return %arg0, %c0_i32 : i32, i32
  }
  func.func @transform_1(%arg0: i32, %arg1: i32) -> (i32, i32) {
    %c0_i32 = arith.constant 0 : i32
    %c0_i32_0 = arith.constant 0 : i32
    return %c0_i32, %arg1 : i32, i32
  }
  func.func @transform_2(%arg0: i32, %arg1: i32) -> (i32, i32) {
    %c0_i32 = arith.constant 0 : i32
    %c0_i32_0 = arith.constant 0 : i32
    return %c0_i32, %arg1 : i32, i32
  }
  func.func @transform_3(%arg0: i32, %arg1: i32) -> (i32, i32) {
    %c0_i32 = arith.constant 0 : i32
    %c0_i32_0 = arith.constant 0 : i32
    return %c0_i32, %arg1 : i32, i32
  }
  func.func @transform_4(%arg0: i32, %arg1: i32) -> (i32, i32) {
    %c0_i32 = arith.constant 0 : i32
    return %arg0, %arg1 : i32, i32
  }
  func.func @transform_5(%arg0: i32, %arg1: i32) -> (i32, i32) {
    %c0_i32 = arith.constant 0 : i32
    return %arg0, %arg1 : i32, i32
  }
}

</mosaic_0001>

<bundles_post_ra>
// kernel: tpu_custom_call.1
= control target key start
LH: loop header
LB: loop body
LE: loop exit
PB: predicated region body
PF: predicated region fallthrough
CT: control target
= control target key end

     0   :  { %11 = vsyncpa [#allocation3], 0  ;;  %s695_s0 = inlined_call_operand.hbm [shape: bf16[16,128], index: 0, kind: input, shape index: {}]   ;;  %s696_s1 = inlined_call_operand.hbm [shape: bf16[128,128], index: 1, kind: input, shape index: {}]   ;;  %s697_s2 = inlined_call_operand.hbm [shape: bf16[128,128], index: 2, kind: input, shape index: {}]   ;;  %s698_s3 = inlined_call_operand.vmem [shape: f32[1,128], index: 3, kind: input, shape index: {}]   ;;  %s699_s4 = inlined_call_operand.hbm [shape: bf16[16,128], index: 4, kind: output, shape index: {0}]   ;;  %s700_s5 = inlined_call_operand.hbm [shape: f32[16,128], index: 5, kind: output, shape index: {1}]  }
   0x1   :  { %12 = vsyncpa [#allocation6], 0 }
   0x2   :  { %13 = vsyncpa [#allocation4], 0 }
   0x3   :  { %14 = vsyncpa [#allocation10], 0  ;;  %s565_s18 = smov [#allocation5]   ;;  %s566_s20 = smov [#allocation2]  }
   0x4   :  { %s32_s19 = sshll.u32 %s565_s18, 4  ;;  %s20_s21 = sshll.u32 %s566_s20, 4  ;;  %s33_s19 = int_to_ptr.vmem [resolvable:$true] %s32_s19  ;;  %s606_s21 = int_to_ptr.vmem [resolvable:$true] %s20_s21 }
   0x5   :  { %s447_s24 = scalar_lea.hbm %s696_s1, 1024 }
   0x6   :  { %p448_p0 = scmp.ne.s32.totalorder %s696_s1, %s447_s24  ;;  %p451_p1 = scmp.lt.u32.totalorder %s447_s24, %s696_s1 }
   0x8   :  { %p453_p2 = pnand %p451_p1, %p448_p0 }
   0xa   :  { %456 = shalt.err (!%p453_p2)
}
   0xb   :  { %s457_s29 = scalar_lea.vmem %s33_s19, 1024  ;;  %p462_p4 = scmp.lt.s32.totalorder %s33_s19, %s33_s19 }
   0xc   :  { %p458_p3 = scmp.ne.s32.totalorder %s33_s19, %s457_s29  ;;  %p463_p5 = scmp.lt.s32.totalorder %s457_s29, %s457_s29 }
   0xe   :  { %p464_p6 = por %p463_p5, %p462_p4 }
  0x10   :  { %p465_p7 = pnand %p464_p6, %p458_p3 }
  0x12   :  { %468 = shalt.err (!%p465_p7)
}
  0x13   :  { %s567_s30 = smov 64   ;;  %s568_s6 = smov 4  }
  0x14   :  { %38 = dma.hbm_to_vmem [thread:$0]  %s696_s1, 1024, %s33_s19, [#allocation6], %s567_s30, %s567_s30, %s568_s6  }
  0x15   :  { %s469_s11 = scalar_lea.hbm %s695_s0, 128 }
  0x16   :  { %p470_p8 = scmp.ne.s32.totalorder %s695_s0, %s469_s11  ;;  %p473_p9 = scmp.lt.u32.totalorder %s469_s11, %s695_s0 }
  0x18   :  { %p475_p10 = pnand %p473_p9, %p470_p8 }
  0x1a   :  { %478 = shalt.err (!%p475_p10)
}
  0x1b   :  { %s479_s16 = scalar_lea.vmem %s606_s21, 128  ;;  %p484_p12 = scmp.lt.s32.totalorder %s606_s21, %s606_s21 }
  0x1c   :  { %p480_p11 = scmp.ne.s32.totalorder %s606_s21, %s479_s16  ;;  %p485_p13 = scmp.lt.s32.totalorder %s479_s16, %s479_s16 }
  0x1e   :  { %p486_p0 = por %p485_p13, %p484_p12 }
  0x20   :  { %p487_p1 = pnand %p486_p0, %p480_p11 }
  0x22   :  { %490 = shalt.err (!%p487_p1)
}
  0x23   :  { %26 = dma.hbm_to_vmem [thread:$0]  %s695_s0, 128, %s606_s21, [#allocation3], %s567_s30, %s567_s30, %s568_s6  }
  0x24   :  { %s569_s18 = smov [#allocation7]   ;;  %s491_s23 = scalar_lea.hbm %s697_s2, 1024 }
  0x25   :  { %s44_s19 = sshll.u32 %s569_s18, 4  ;;  %p492_p2 = scmp.ne.s32.totalorder %s697_s2, %s491_s23  ;;  %s45_s19 = int_to_ptr.vmem [resolvable:$true] %s44_s19 }
  0x26   :  { %p495_p3 = scmp.lt.u32.totalorder %s491_s23, %s697_s2 }
  0x28   :  { %p497_p4 = pnand %p495_p3, %p492_p2 }
  0x2a   :  { %500 = shalt.err (!%p497_p4)
}
  0x2b   :  { %s501_s28 = scalar_lea.vmem %s45_s19, 1024  ;;  %p506_p6 = scmp.lt.s32.totalorder %s45_s19, %s45_s19 }
  0x2c   :  { %p502_p5 = scmp.ne.s32.totalorder %s45_s19, %s501_s28  ;;  %p507_p7 = scmp.lt.s32.totalorder %s501_s28, %s501_s28 }
  0x2e   :  { %p508_p8 = por %p507_p7, %p506_p6 }
  0x30   :  { %p509_p9 = pnand %p508_p8, %p502_p5 }
  0x32   :  { %512 = shalt.err (!%p509_p9)
}
  0x33   :  { %50 = dma.hbm_to_vmem [thread:$0]  %s697_s2, 1024, %s45_s19, [#allocation6], %s567_s30, %s567_s30, %s568_s6  }
  0x34   :  { %557 = dma.done.wait [#allocation3], 128  }
  0x35   :  { %558 = vsyncadd [#allocation3], 4294967168 }
  0x36   :  { %559 = dma.done.wait [#allocation6], 2048  }
  0x37   :  { %560 = vsyncadd [#allocation6], 4294965248  ;;  %v570_v0 = vmov 0.0   ;;  %vm571_vm0 = vmmov 0   ;;  %v430_v1 = vld [vmem:[#allocation5] sm:$0xff]   ;;  %v432_v3 = vld [vmem:[#allocation5 + $0x8] sm:$0xff]  }
  0x38   :  { %379 = vmatprep.subr.bf16.mxu0 %v570_v0  ;;  %399 = vmatprep.subr.bf16.mxu1 %v570_v0  ;;  %v431_v2 = vld [vmem:[#allocation7] sm:$0xff]   ;;  %v433_v4 = vld [vmem:[#allocation7 + $0x8] sm:$0xff]   ;;  %v434_v5 = vld [vmem:[#allocation5 + $0x10] sm:$0xff]   ;;  %s572_s7 = smov [#allocation8]   ;;  %s573_s9 = smov [#allocation9]  }
  0x39   :  { %395 = vmatprep.mubr.msk.bf16.mxu0 %vm571_vm0, %v570_v0  ;;  %415 = vmatprep.mubr.msk.bf16.mxu1 %vm571_vm0, %v570_v0  ;;  %v435_v6 = vld [vmem:[#allocation7 + $0x10] sm:$0xff]   ;;  %v436_v7 = vld [vmem:[#allocation5 + $0x18] sm:$0xff]   ;;  %v438_v9 = vld [vmem:[#allocation5 + $0x20] sm:$0xff]   ;;  %s305_s8 = sshll.u32 %s572_s7, 4  ;;  %s317_s10 = sshll.u32 %s573_s9, 4  ;;  %s306_s8 = int_to_ptr.vmem [resolvable:$true] %s305_s8  ;;  %s661_s10 = int_to_ptr.vmem [resolvable:$true] %s317_s10 }
  0x3a   :  { %380 = vmatpush3.bf16.msra.mxu0 %v430_v1  ;;  %400 = vmatpush3.bf16.msra.mxu1 %v431_v2  ;;  %v437_v8 = vld [vmem:[#allocation7 + $0x18] sm:$0xff]   ;;  %v439_v10 = vld [vmem:[#allocation7 + $0x20] sm:$0xff]   ;;  %v440_v11 = vld [vmem:[#allocation5 + $0x28] sm:$0xff]   ;;  %p518_p11 = scmp.lt.s32.totalorder %s306_s8, %s306_s8 }
  0x3b   :  { %381 = vmatprep.subr.bf16.mxu0 %v570_v0  ;;  %401 = vmatprep.subr.bf16.mxu1 %v570_v0  ;;  %v441_v12 = vld [vmem:[#allocation7 + $0x28] sm:$0xff]   ;;  %v442_v13 = vld [vmem:[#allocation5 + $0x30] sm:$0xff]   ;;  %v444_v15 = vld [vmem:[#allocation5 + $0x38] sm:$0xff]  }
  0x3c   :  { %v443_v14 = vld [vmem:[#allocation7 + $0x30] sm:$0xff]   ;;  %v445_v16 = vld [vmem:[#allocation7 + $0x38] sm:$0xff]  }
  0x3d   :  { %v446_v17 = vld [vmem:[#allocation2] sm:$0xff]  }
  0x3e   :  { %382 = vmatpush3.bf16.msra.mxu0 %v432_v3  ;;  %402 = vmatpush3.bf16.msra.mxu1 %v433_v4  ;;  %v345_v18 = vld [vmem:[%s698_s3] ss:$0 sm:$0xff]  ;;  %s513_s3 = scalar_lea.vmem %s306_s8, 128 }
  0x3f   :  { %383 = vmatprep.subr.bf16.mxu0 %v570_v0  ;;  %403 = vmatprep.subr.bf16.mxu1 %v570_v0  ;;  %p514_p10 = scmp.ne.s32.totalorder %s306_s8, %s513_s3  ;;  %p519_p12 = scmp.lt.s32.totalorder %s513_s3, %s513_s3 }
  0x41   :  { %p520_p13 = por %p519_p12, %p518_p11 }
  0x42   :  { %384 = vmatpush3.bf16.msra.mxu0 %v434_v5  ;;  %404 = vmatpush3.bf16.msra.mxu1 %v435_v6 }
  0x43   :  { %385 = vmatprep.subr.bf16.mxu0 %v570_v0  ;;  %405 = vmatprep.subr.bf16.mxu1 %v570_v0  ;;  %p521_p0 = pnand %p520_p13, %p514_p10 }
  0x46   :  { %386 = vmatpush3.bf16.msra.mxu0 %v436_v7  ;;  %406 = vmatpush3.bf16.msra.mxu1 %v437_v8 }
  0x47   :  { %387 = vmatprep.subr.bf16.mxu0 %v570_v0  ;;  %407 = vmatprep.subr.bf16.mxu1 %v570_v0 }
  0x4a   :  { %388 = vmatpush3.bf16.msra.mxu0 %v438_v9  ;;  %408 = vmatpush3.bf16.msra.mxu1 %v439_v10 }
  0x4b   :  { %389 = vmatprep.subr.bf16.mxu0 %v570_v0  ;;  %409 = vmatprep.subr.bf16.mxu1 %v570_v0 }
  0x4e   :  { %390 = vmatpush3.bf16.msra.mxu0 %v440_v11  ;;  %410 = vmatpush3.bf16.msra.mxu1 %v441_v12 }
  0x4f   :  { %391 = vmatprep.subr.bf16.mxu0 %v570_v0  ;;  %411 = vmatprep.subr.bf16.mxu1 %v570_v0 }
  0x52   :  { %392 = vmatpush3.bf16.msra.mxu0 %v442_v13  ;;  %412 = vmatpush3.bf16.msra.mxu1 %v443_v14 }
  0x53   :  { %393 = vmatprep.subr.bf16.mxu0 %v570_v0  ;;  %413 = vmatprep.subr.bf16.mxu1 %v570_v0 }
  0x56   :  { %394 = vmatpush3.bf16.msra.mxu0 %v444_v15  ;;  %414 = vmatpush3.bf16.msra.mxu1 %v445_v16 }
  0x59   :  { %396 = vmatmul.mubr.bf16.vlgmr.msra.gmra.mrb[0].mxu0 %v446_v17  ;;  %416 = vmatmul.mubr.bf16.vlgmr.msra.gmra.mrb[0].mxu1 %v446_v17 }
 0x12c   :  { %v169_v19 = vpop.f32.mrb[0].mxu0  ;;  %v291_v20 = vpop.f32.mrb[0].mxu1 }
 0x12d   :  { %v397_v21 = vpop.f32.mrb[1].mxu0  ;;  %v292_v22 = vadd.f32 %v345_v18, %v291_v20  ;;  %v417_v23 = vpop.f32.mrb[1].mxu1 }
 0x12e   :  { %v172_v24 = vpop.f32.mrb[2].mxu0  ;;  %v294_v26 = vpop.f32.mrb[2].mxu1 }
 0x12f   :  { %v359_v25 = vpack.c.bf16 %v172_v24, %v169_v19  ;;  %v398_v27 = vpop.f32.mrb[3].mxu0  ;;  %298 = vst [vmem:[#allocation9] sm:$0xff] %v292_v22  ;;  %v295_v28 = vadd.f32 %v345_v18, %v294_v26  ;;  %v418_v29 = vpop.f32.mrb[3].mxu1 }
 0x131   :  { %360 = vst [vmem:[#allocation8] sm:$0xff] %v359_v25   ;;  %299 = vst [vmem:[#allocation9 + $0x8] sm:$0xff] %v295_v28 }
 0x132   :  { %524 = shalt.err (!%p521_p0)
}
 0x133   :  { %s525_s13 = scalar_lea.hbm %s699_s4, 128 }
 0x134   :  { %p526_p1 = scmp.ne.s32.totalorder %s699_s4, %s525_s13  ;;  %p529_p2 = scmp.lt.u32.totalorder %s525_s13, %s699_s4 }
 0x136   :  { %p531_p3 = pnand %p529_p2, %p526_p1 }
 0x138   :  { %534 = shalt.err (!%p531_p3)
}
 0x139   :  { %311 = dma.vmem_to_hbm [thread:$0]  %s306_s8, 128, %s699_s4, [#allocation4], %s567_s30, %s567_s30, %s568_s6  }
 0x13a   :  { %s535_s19 = scalar_lea.vmem %s661_s10, 256  ;;  %p540_p5 = scmp.lt.s32.totalorder %s661_s10, %s661_s10 }
 0x13b   :  { %p536_p4 = scmp.ne.s32.totalorder %s661_s10, %s535_s19  ;;  %p541_p6 = scmp.lt.s32.totalorder %s535_s19, %s535_s19 }
 0x13d   :  { %p542_p7 = por %p541_p6, %p540_p5 }
 0x13f   :  { %p543_p8 = pnand %p542_p7, %p536_p4 }
 0x141   :  { %546 = shalt.err (!%p543_p8)
}
 0x142   :  { %s547_s23 = scalar_lea.hbm %s700_s5, 256 }
 0x143   :  { %p548_p9 = scmp.ne.s32.totalorder %s700_s5, %s547_s23  ;;  %p551_p10 = scmp.lt.u32.totalorder %s547_s23, %s700_s5 }
 0x145   :  { %p553_p11 = pnand %p551_p10, %p548_p9 }
 0x147   :  { %556 = shalt.err (!%p553_p11)
}
 0x148   :  { %s574_s4 = smov 128   ;;  %s575_s30 = smov 8  }
 0x149   :  { %323 = dma.vmem_to_hbm [thread:$0]  %s661_s10, 256, %s700_s5, [#allocation10], %s574_s4, %s574_s4, %s575_s30  }
 0x14a   :  { %561 = dma.done.wait [#allocation4], 128  }
 0x14b   :  { %562 = vsyncadd [#allocation4], 4294967168 }
 0x14c   :  { %563 = dma.done.wait [#allocation10], 256  }
 0x14d   :  { %564 = vsyncadd [#allocation10], 4294967040 }
 0x14e   :  { %330 = vsyncpa [#allocation3], 1 }
 0x14f   :  { %331 = vsyncpa [#allocation6], 1 }
 0x150   :  { %332 = vsyncpa [#allocation4], 1 }
 0x151   :  { %333 = vsyncpa [#allocation10], 1 }

</bundles_post_ra>
